<compile_context>
chip_gen: v5e
topology: v5e:2x2
jax: 0.10.0
libtpu: 0.0.40
codegen_flags: <defaults>
</compile_context>

<pallas_src>
import jax
import jax.numpy as jnp
from jax.experimental import pallas as pl
from jax.experimental.pallas import tpu as pltpu


def _mlp_kernel(x_ref, w1_ref, b1_ref, w2_ref, b2_ref, o_ref):
    """Fused Linear -> ReLU -> Linear for one batch tile.

    x:  (TILE_B, D_IN)  f32  (cast to bf16 in-kernel)
    w1: (D_IN, H)       bf16 (pre-transposed, resident across grid iters)
    b1: (1, H)          f32
    w2: (H, D_OUT)      bf16 (pre-transposed, resident)
    b2: (1, D_OUT)      f32
    o:  (TILE_B, D_OUT) bf16
    """
    x = x_ref[...].astype(jnp.bfloat16)                        # in-kernel cast (VPU)
    h = jnp.dot(x, w1_ref[...],
                preferred_element_type=jnp.float32)            # MXU, f32 acc
    h = jnp.maximum(h + b1_ref[...], 0.0)                      # f32 bias + ReLU
    y = jnp.dot(h.astype(w2_ref.dtype), w2_ref[...],
                preferred_element_type=jnp.float32)            # MXU, f32 acc
    o_ref[...] = (y + b2_ref[...]).astype(o_ref.dtype)         # bf16 writeback


def _choose_tile_b(B):
    """Largest 128-aligned batch tile, capped at 512, that keeps >=2 grid
    steps when the batch allows it (so megacore / both v7x TCs get work)."""
    tile = max(128, min(512, pl.cdiv(B, 2)))
    return ((tile + 127) // 128) * 128


def mlp_forward(x, w1_t, b1, w2_t, b2, *, tile_b=None, out_dtype=jnp.bfloat16):
    """x: (B, d_in) f32; w1_t: (d_in, H) bf16; w2_t: (H, d_out) bf16."""
    B, d_in = x.shape
    d_in2, hidden = w1_t.shape
    hidden2, d_out = w2_t.shape
    assert d_in == d_in2 and hidden == hidden2

    if tile_b is None:
        tile_b = _choose_tile_b(B)

    grid_b = pl.cdiv(B, tile_b)
    b_pad = grid_b * tile_b
    if b_pad != B:
        # Zero-pad the batch so every grid step sees a full tile; padded rows
        # are sliced off below (their values are never used).
        x = jnp.pad(x, ((0, b_pad - B), (0, 0)))

    flops = 2 * b_pad * (d_in * hidden + hidden * d_out)
    bytes_accessed = (
        b_pad * d_in * 4                                 # x read (f32)
        + w1_t.size * w1_t.dtype.itemsize                # W1 (bf16)
        + w2_t.size * w2_t.dtype.itemsize                # W2 (bf16)
        + b1.size * 4 + b2.size * 4                      # biases (f32)
        + b_pad * d_out * jnp.dtype(out_dtype).itemsize  # out write
    )

    out = pl.pallas_call(
        _mlp_kernel,
        out_shape=jax.ShapeDtypeStruct((b_pad, d_out), out_dtype),
        grid_spec=pl.GridSpec(
            grid=(grid_b,),
            in_specs=[
                pl.BlockSpec((tile_b, d_in), lambda i: (i, 0)),   # x: tiled
                pl.BlockSpec((d_in, hidden), lambda i: (0, 0)),   # W1 resident
                pl.BlockSpec((1, hidden), lambda i: (0, 0)),      # b1 resident
                pl.BlockSpec((hidden, d_out), lambda i: (0, 0)),  # W2 resident
                pl.BlockSpec((1, d_out), lambda i: (0, 0)),       # b2 resident
            ],
            out_specs=pl.BlockSpec((tile_b, d_out), lambda i: (i, 0)),
        ),
        compiler_params=pltpu.CompilerParams(
            dimension_semantics=("parallel",),
            # Working set (double-buffered x/out tiles + resident weights) is
            # well under 2 MiB even at tile_b=512; 32 MiB is safe on every
            # generation (v7x physical VMEM is 64 MiB).
            vmem_limit_bytes=32 * 1024 * 1024),
        cost_estimate=pl.CostEstimate(
            flops=flops, transcendentals=0, bytes_accessed=bytes_accessed),
    )(x, w1_t, b1, w2_t, b2)

    return out[:B] if b_pad != B else out


class PureDistributedDataParallel:
    """JAX analogue of torchft's PureDistributedDataParallel.

    forward() simply delegates to the wrapped module.
    """
    # TODO(synk): per-parameter post-accumulate-grad allreduce hook
    # (manager.allreduce_grad) is backward-only; no forward-pass Pallas
    # equivalent exists.

    def __init__(self, module):
        self.module = module

    def __call__(self, *args):
        return self.module(*args)


class PallasMLP:
    """Wrapped module: Linear(d_in, H) -> ReLU -> Linear(H, d_out)."""

    def __init__(self, key, d_in=128, hidden=128, d_out=128):
        k1, k2, k3, k4 = jax.random.split(key, 4)
        # PyTorch nn.Linear default init: U(-1/sqrt(fan_in), 1/sqrt(fan_in)),
        # weights stored PyTorch-style (out_features, in_features) ...
        bound1 = 1.0 / jnp.sqrt(d_in)
        bound2 = 1.0 / jnp.sqrt(hidden)
        w1 = jax.random.uniform(k1, (hidden, d_in), jnp.float32, -bound1, bound1)
        b1 = jax.random.uniform(k2, (hidden,), jnp.float32, -bound1, bound1)
        w2 = jax.random.uniform(k3, (d_out, hidden), jnp.float32, -bound2, bound2)
        b2 = jax.random.uniform(k4, (d_out,), jnp.float32, -bound2, bound2)

        # ... but handed to the kernel pre-transposed and in bf16 so the MXU
        # consumes them directly (contracting dim last, no in-kernel .T).
        # Note: on v6e/v7x (256-wide MXU) 128-wide features occupy only one
        # quadrant of the array; that is a model-shape choice, not a kernel
        # limitation — wider hidden/d_out would raise MXU occupancy.
        self.w1_t = jnp.asarray(w1.T, jnp.bfloat16)   # (d_in, hidden)
        self.w2_t = jnp.asarray(w2.T, jnp.bfloat16)   # (hidden, d_out)
        self.b1 = b1.reshape(1, hidden)               # f32
        self.b2 = b2.reshape(1, d_out)                # f32

        # f32 originals kept only for the reference check in __main__.
        self._w1_f32, self._b1_f32 = w1, b1
        self._w2_f32, self._b2_f32 = w2, b2

    def __call__(self, x):
        # x stays f32: the bf16 cast happens inside the kernel.
        return mlp_forward(x, self.w1_t, self.b1, self.w2_t, self.b2)


def _check(out, x, inner, atol_exact=1e-2, atol_f32=5e-2):
    out_f32 = out.astype(jnp.float32)

    # Reference 1: mirror the kernel's dtypes (bf16 inputs / hidden fed to
    # the matmuls, f32 accumulation, bf16 output rounding) -> tight tolerance.
    xb = x.astype(jnp.bfloat16).astype(jnp.float32)
    w1b = inner.w1_t.astype(jnp.float32)
    w2b = inner.w2_t.astype(jnp.float32)
    h_ref = jnp.maximum(xb @ w1b + inner.b1, 0.0)
    h_ref_b = h_ref.astype(jnp.bfloat16).astype(jnp.float32)
    ref_exact = h_ref_b @ w2b + inner.b2
    assert jnp.allclose(out_f32, ref_exact, atol=atol_exact, rtol=atol_exact)

    # Reference 2: full-f32 original-module semantics -> bf16-relaxed tolerance.
    h_f32 = jnp.maximum(x @ inner._w1_f32.T + inner._b1_f32, 0.0)
    ref_f32 = h_f32 @ inner._w2_f32.T + inner._b2_f32
    assert jnp.allclose(out_f32, ref_f32, atol=atol_f32, rtol=atol_f32)


if __name__ == "__main__":
    key = jax.random.PRNGKey(0)
    k_params, k_x1, k_x2 = jax.random.split(key, 3)

    D_IN, HID, D_OUT = 128, 128, 128
    inner = PallasMLP(k_params, d_in=D_IN, hidden=HID, d_out=D_OUT)
    ddp = PureDistributedDataParallel(inner)

    # Case 1: batch a multiple of the tile (grid of 2 -> both v7x TCs busy).
    B1 = 256
    x1 = jax.random.normal(k_x1, (B1, D_IN), jnp.float32)
    out1 = jax.block_until_ready(ddp(x1))
    assert out1.shape == (B1, D_OUT) and out1.dtype == jnp.bfloat16
    _check(out1, x1, inner)

    # Case 2: ragged batch (exercises cdiv + zero-pad path, no assert).
    B2 = 200
    x2 = jax.random.normal(k_x2, (B2, D_IN), jnp.float32)
    out2 = jax.block_until_ready(ddp(x2))
    assert out2.shape == (B2, D_OUT) and out2.dtype == jnp.bfloat16
    _check(out2, x2, inner)

    print("KERNEL_OK")
</pallas_src>

<mosaic_0001>
module attributes {stable_mosaic.version = 11 : i64} {
  func.func @_mlp_kernel(%arg0: i32, %arg1: memref<128x128xf32, #tpu.memory_space<vmem>>, %arg2: memref<128x128xbf16, #tpu.memory_space<vmem>>, %arg3: memref<1x128xf32, #tpu.memory_space<vmem>>, %arg4: memref<128x128xbf16, #tpu.memory_space<vmem>>, %arg5: memref<1x128xf32, #tpu.memory_space<vmem>>, %arg6: memref<128x128xbf16, #tpu.memory_space<vmem>>) attributes {dimension_semantics = [#tpu.dimension_semantics<parallel>], iteration_bounds = array<i64: 2>, scalar_prefetch = 0 : i64, scratch_operands = 0 : i64, tpu.core_type = #tpu.core_type<tc>, window_params = [{transform_indices = @transform_0, window_bounds = array<i64: 128, 128>}, {pipeline_mode = #tpu.pipeline_mode<synchronous>, transform_indices = @transform_1, window_bounds = array<i64: 128, 128>}, {pipeline_mode = #tpu.pipeline_mode<synchronous>, transform_indices = @transform_2, window_bounds = array<i64: 1, 128>}, {pipeline_mode = #tpu.pipeline_mode<synchronous>, transform_indices = @transform_3, window_bounds = array<i64: 128, 128>}, {pipeline_mode = #tpu.pipeline_mode<synchronous>, transform_indices = @transform_4, window_bounds = array<i64: 1, 128>}, {transform_indices = @transform_5, window_bounds = array<i64: 128, 128>}]} {
    %c0 = arith.constant 0 : index
    %c0_0 = arith.constant 0 : index
    %0 = vector.load %arg1[%c0, %c0_0] : memref<128x128xf32, #tpu.memory_space<vmem>>, vector<128x128xf32>
    %1 = arith.truncf %0 : vector<128x128xf32> to vector<128x128xbf16>
    %c0_1 = arith.constant 0 : index
    %c0_2 = arith.constant 0 : index
    %2 = vector.load %arg2[%c0_1, %c0_2] : memref<128x128xbf16, #tpu.memory_space<vmem>>, vector<128x128xbf16>
    %cst = arith.constant dense<0.000000e+00> : vector<128x128xf32>
    %3 = tpu.matmul %1, %2, %cst {dimension_numbers = #tpu.dot_dimension_numbers<[1], [0], [0], [1], [0, 0, 1, 1], [], []>} : vector<128x128xbf16>, vector<128x128xbf16>, vector<128x128xf32> -> vector<128x128xf32>
    %c0_3 = arith.constant 0 : index
    %c0_4 = arith.constant 0 : index
    %4 = vector.load %arg3[%c0_3, %c0_4] : memref<1x128xf32, #tpu.memory_space<vmem>>, vector<1x128xf32>
    %5 = vector.broadcast %4 : vector<1x128xf32> to vector<128x128xf32>
    %6 = arith.addf %3, %5 : vector<128x128xf32>
    %cst_5 = arith.constant 0.000000e+00 : f32
    %7 = vector.broadcast %cst_5 : f32 to vector<128x128xf32>
    %8 = arith.maximumf %6, %7 : vector<128x128xf32>
    %9 = arith.truncf %8 : vector<128x128xf32> to vector<128x128xbf16>
    %c0_6 = arith.constant 0 : index
    %c0_7 = arith.constant 0 : index
    %10 = vector.load %arg4[%c0_6, %c0_7] : memref<128x128xbf16, #tpu.memory_space<vmem>>, vector<128x128xbf16>
    %cst_8 = arith.constant dense<0.000000e+00> : vector<128x128xf32>
    %11 = tpu.matmul %9, %10, %cst_8 {dimension_numbers = #tpu.dot_dimension_numbers<[1], [0], [0], [1], [0, 0, 1, 1], [], []>} : vector<128x128xbf16>, vector<128x128xbf16>, vector<128x128xf32> -> vector<128x128xf32>
    %c0_9 = arith.constant 0 : index
    %c0_10 = arith.constant 0 : index
    %12 = vector.load %arg5[%c0_9, %c0_10] : memref<1x128xf32, #tpu.memory_space<vmem>>, vector<1x128xf32>
    %13 = vector.broadcast %12 : vector<1x128xf32> to vector<128x128xf32>
    %14 = arith.addf %11, %13 : vector<128x128xf32>
    %15 = arith.truncf %14 : vector<128x128xf32> to vector<128x128xbf16>
    %c0_11 = arith.constant 0 : index
    %c0_12 = arith.constant 0 : index
    %16 = vector.load %arg6[%c0_11, %c0_12] : memref<128x128xbf16, #tpu.memory_space<vmem>>, vector<128x128xbf16>
    tpu.vector_store %arg6[%c0_11, %c0_12], %15 {strides = array<i32>} : memref<128x128xbf16, #tpu.memory_space<vmem>>, vector<128x128xbf16>,
    return
  }
  func.func @transform_0(%arg0: i32) -> (i32, i32) {
    %c0_i32 = arith.constant 0 : i32
    %c0_i32_0 = arith.constant 0 : i32
    return %arg0, %c0_i32 : i32, i32
  }
  func.func @transform_1(%arg0: i32) -> (i32, i32) {
    %c0_i32 = arith.constant 0 : i32
    %c0_i32_0 = arith.constant 0 : i32
    %c0_i32_1 = arith.constant 0 : i32
    return %c0_i32, %c0_i32_0 : i32, i32
  }
  func.func @transform_2(%arg0: i32) -> (i32, i32) {
    %c0_i32 = arith.constant 0 : i32
    %c0_i32_0 = arith.constant 0 : i32
    %c0_i32_1 = arith.constant 0 : i32
    return %c0_i32, %c0_i32_0 : i32, i32
  }
  func.func @transform_3(%arg0: i32) -> (i32, i32) {
    %c0_i32 = arith.constant 0 : i32
    %c0_i32_0 = arith.constant 0 : i32
    %c0_i32_1 = arith.constant 0 : i32
    return %c0_i32, %c0_i32_0 : i32, i32
  }
  func.func @transform_4(%arg0: i32) -> (i32, i32) {
    %c0_i32 = arith.constant 0 : i32
    %c0_i32_0 = arith.constant 0 : i32
    %c0_i32_1 = arith.constant 0 : i32
    return %c0_i32, %c0_i32_0 : i32, i32
  }
  func.func @transform_5(%arg0: i32) -> (i32, i32) {
    %c0_i32 = arith.constant 0 : i32
    %c0_i32_0 = arith.constant 0 : i32
    return %arg0, %c0_i32 : i32, i32
  }
}

</mosaic_0001>

<bundles_post_ra>
// kernel: tpu_custom_call.1
= control target key start
LH: loop header
LB: loop body
LE: loop exit
PB: predicated region body
PF: predicated region fallthrough
CT: control target
= control target key end

     0   :  { %10 = vsyncpa [#allocation3], 0  ;;  %s1317_s0 = inlined_call_operand.hbm [shape: f32[256,128], index: 0, kind: input, shape index: {}]   ;;  %s1318_s1 = inlined_call_operand.hbm [shape: bf16[128,128], index: 1, kind: input, shape index: {}]   ;;  %s1319_s2 = inlined_call_operand.vmem [shape: f32[1,128], index: 2, kind: input, shape index: {}]   ;;  %s1320_s3 = inlined_call_operand.hbm [shape: bf16[128,128], index: 3, kind: input, shape index: {}]   ;;  %s1321_s4 = inlined_call_operand.vmem [shape: f32[1,128], index: 4, kind: input, shape index: {}]   ;;  %s1322_s5 = inlined_call_operand.hbm [shape: bf16[256,128], index: 5, kind: output, shape index: {}]  }
   0x1   :  { %12 = vsyncpa [#allocation3 + $0x1], 0 }
   0x2   :  { %13 = vsyncpa [#allocation6], 0 }
   0x3   :  { %14 = vsyncpa [#allocation4], 0 }
   0x4   :  { %16 = vsyncpa [#allocation4 + $0x1], 0  ;;  %s1140_s18 = smov 0   ;;  %s1142_s19 = smov 0  }
   0x5   :  { %s1144_s20 = smov 0   ;;  %s1146_s21 = smov 0  }
   0x6 LB: > { %s1161_s22 = sadd.s32 4294967295, %s1100_s21   ;;  %s702_s23 = sadd.s32 4294967294, %s1100_s21   ;;  %s1100_s21 = sphi %s1146_s21, %s1332_s21   ;;  %s1096_s20 = sphi %s1144_s20, %s1331_s20   ;;  %s1092_s19 = sphi %s1142_s19, %s1330_s19   ;;  %s1088_s18 = sphi %s1140_s18, %s1329_s18  }
   0x7   : > { %p42_p0 = scmp.ne.s32.totalorder %s1092_s19, %s1088_s18  ;;  %p43_p1 = scmp.eq.s32.totalorder %s1161_s22, 0 }
   0x8   : > { %p150_p2 = scmp.eq.s32.totalorder %s1161_s22, 1  ;;  %p156_p3 = scmp.eq.s32.totalorder %s702_s23, 1 }
   0x9   : > { %p1170_p4 = por %p43_p1, %p42_p0  ;;  %p703_p5 = scmp.ge.s32.totalorder %s1100_s21, 1 }
   0xa   : > { %p1175_p6 = por %p156_p3, %p42_p0  ;;  %p163_p7 = scmp.lt.s32.totalorder %s1100_s21, 3 }
   0xb   : > { %s174_s28 = sshll.u32 %s1318_s1, 4  ;;  %s1102_s30 = smov [#allocation5]   ;;  %s175_s28 = int_to_ptr.hbm [resolvable:$true] %s174_s28 }
   0xc   : > { %p1183_p8 = pnand %p703_p5, %p163_p7  ;;  %s176_s6 = sshll.u32 %s1102_s30, 4  ;;  %s177_s6 = int_to_ptr.vmem [resolvable:$true] %s176_s6 }
   0xd   : > { %s191_s9 = sshll.u32 %s1320_s3, 4  ;;  %s1103_s10 = smov 64   ;;  %s192_s9 = int_to_ptr.hbm [resolvable:$true] %s191_s9 }
   0xe   : > { %p877_p9 = pneg %p1183_p8  ;;  %s1104_s11 = smov 4  }
   0xf   : > { %s1105_s12 = smov [#allocation7]   ;;  %s1196_s14 = sadd.s32 1, %s1100_s21  }
  0x10   : > { %p878_p10 = pnand %p877_p9, %p43_p1  ;;  %s193_s13 = sshll.u32 %s1105_s12, 4  ;;  %s194_s13 = int_to_ptr.vmem [resolvable:$true] %s193_s13 }
  0x11   : > { %s29_s15 = sadd.s32 1, %s1096_s20  ;;  %s26_s16 = ssub.s32 %s1100_s21, %s1196_s14 }
  0x12   : > { %880 = dma.hbm_to_vmem [thread:$0]  (!%p878_p10), %s175_s28, 1024, %s177_s6, [#allocation6], %s1103_s10, %s1103_s10, %s1104_s11  }
  0x13   : > { %883 = dma.hbm_to_vmem [thread:$0]  (!%p878_p10), %s192_s9, 1024, %s194_s13, [#allocation6], %s1103_s10, %s1103_s10, %s1104_s11  }
  0x14   : > { %p36_p12 = scmp.ne.s32.totalorder %s1096_s20, %s1092_s19  ;;  %p27_p13 = scmp.eq.s32.totalorder %s26_s16, 0 }
  0x15   : > { %p37_p0 = scmp.eq.s32.totalorder %s1100_s21, 0  ;;  %p894_p5 = scmp.lt.s32.totalorder %s1100_s21, 2 }
  0x16   : > { %p1206_p3 = por %p150_p2, %p36_p12  ;;  %s210_s26 = sand.u32 1, %s1096_s20  }
  0x17   : > { %s1212_s23 = scalar_select %p27_p13, %s1096_s20, %s29_s15  }
  0x18   : > { %p38_p7 = por %p37_p0, %p36_p12  ;;  %s707_s27 = sshll.u32 %s210_s26, 7 }
  0x19   : > { %s784_s28 = sshll.u32 %s1100_s21, 7  ;;  %s214_s8 = scalar_lea.vmem [#allocation2], %s707_s27 }
  0x1a   : > { %s219_s7 = scalar_lea.hbm %s1317_s0, %s784_s28  ;;  %s222_s9 = sshll.u32 %s214_s8, 4  ;;  %s223_s9 = int_to_ptr.vmem [resolvable:$true] %s222_s9 }
  0x1b   : > { %s220_s10 = sshll.u32 %s219_s7, 4  ;;  %p1219_p2 = pnand %p894_p5, %p38_p7  ;;  %s221_s10 = int_to_ptr.hbm [resolvable:$true] %s220_s10 }
  0x1c   : > { %s211_s12 = scalar_lea.sflag [#allocation3], %s210_s26  ;;  %s1000_s13 = sshra.s32 %s221_s10, 4  ;;  %s1001_s13 = int_to_ptr.hbm [resolvable:$true] %s1000_s13 }
  0x1d   : > { %s1002_s15 = scalar_lea.hbm %s1001_s13, 128  ;;  %p1004_p10 = pneg %p1219_p2 }
  0x1e   : > { %p1003_p9 = scmp.ne.s32.totalorder %s1001_s13, %s1002_s15  ;;  %s1007_s28 = scalar_lea.hbm %s1317_s0, 256 }
  0x1f   : > { %p1008_p0 = scmp.lt.s32.totalorder %s1001_s13, %s1317_s0  ;;  %p1009_p5 = scmp.lt.s32.totalorder %s1007_s28, %s1002_s15 }
  0x20   : > { %p1005_p12 = pnand %p1004_p10, %p1003_p9 }
  0x21   : > { %p1010_p7 = por %p1009_p5, %p1008_p0 }
  0x22   : > { %p1006_p13 = pneg %p1005_p12 }
  0x24   : > { %p1011_p11 = pnand %p1010_p7, %p1006_p13 }
  0x26   : > { %1014 = shalt.err (!%p1011_p11)
}
  0x27   : > { %s1106_s26 = smov 128   ;;  %s1107_s7 = smov 8  }
  0x28   : > { %887 = dma.hbm_to_vmem [thread:$0]  (!%p1219_p2), %s221_s10, 2048, %s223_s9, %s211_s12, %s1106_s26, %s1106_s26, %s1107_s7  }
  0x29   : > { %234 = sbr.rel (%p1183_p8) target bundleno = 423 (0x1a7), region = 40  ;;  %s1236_s8 = sand.u32 (!%p1183_p8), 1, %s1092_s19  }
  0x2a   : > { %s711_s16 = sshll.u32 (!%p1183_p8), %s1236_s8, 7  ;;  %s237_s13 = scalar_lea.sflag (!%p1183_p8), [#allocation3], %s1236_s8 }
  0x2b   : > { %s1240_s15 = scalar_lea.vmem (!%p1183_p8), [#allocation2], %s711_s16 }
  0x2e   : > { %1075 = dma.done.wait (%p1170_p4), %s237_s13, 2048  }
  0x2f   : > { %1077 = vsyncadd (%p1170_p4), %s237_s13, 4294965248 }
  0x30   : > { %1079 = dma.done.wait (%p43_p1), [#allocation6], 2048  }
  0x31   : > { %1081 = vsyncadd (%p43_p1), [#allocation6], 4294965248  ;;  %v792_v0 = vld [vmem:[#allocation5 + $0x38] sm:$0xff]  ;;  %v791_v1 = vld [vmem:[#allocation5 + $0x30] sm:$0xff]  ;;  %s714_s11 = sshll.u32 %s1236_s8, 6  ;;  %s801_s27 = sshll.u32 %s1161_s22, 6 }
  0x32   : > { %372 = vmatpush.bf16.msra.mxu0 %v792_v0  ;;  %849 = vmatpush.bf16.msra.mxu2 %v792_v0  ;;  %v790_v2 = vld [vmem:[#allocation5 + $0x28] sm:$0xff]  ;;  %v789_v3 = vld [vmem:[#allocation5 + $0x20] sm:$0xff]  ;;  %v788_v4 = vld [vmem:[#allocation5 + $0x18] sm:$0xff]  ;;  %s1273_s12 = scalar_lea.vmem [#allocation8], %s714_s11  ;;  %s606_s6 = scalar_lea.hbm %s1322_s5, %s801_s27 }
  0x33   : > { %v787_v5 = vld [vmem:[#allocation5 + $0x10] sm:$0xff]  ;;  %v786_v6 = vld [vmem:[#allocation5 + $0x8] sm:$0xff]  ;;  %v785_v7 = vld [vmem:[#allocation5] sm:$0xff]  ;;  %s607_s26 = sshll.u32 %s1273_s12, 4  ;;  %s609_s7 = sshll.u32 %s606_s6, 4  ;;  %s608_s26 = int_to_ptr.vmem [resolvable:$true] %s607_s26  ;;  %s610_s7 = int_to_ptr.hbm [resolvable:$true] %s609_s7 }
  0x34   : > { %v280_v8 = vld [vmem:[%s1240_s15] sm:$0xff]  ;;  %v281_v9 = vld [vmem:[%s1240_s15 + $0x8] sm:$0xff]  ;;  %v282_v14 = vld [vmem:[%s1240_s15 + $0x10] sm:$0xff]  ;;  %s595_s16 = scalar_lea.sflag [#allocation4], %s1236_s8  ;;  %s1044_s13 = sshra.s32 %s610_s7, 4  ;;  %s1045_s13 = int_to_ptr.hbm [resolvable:$true] %s1044_s13 }
  0x35   : > { %v288_v10 = vld [vmem:[%s1240_s15 + $0x40] sm:$0xff]  ;;  %v289_v11 = vld [vmem:[%s1240_s15 + $0x48] sm:$0xff]  ;;  %v296_v12 = vpack.c.bf16 %v281_v9, %v280_v8  ;;  %v283_v15 = vld [vmem:[%s1240_s15 + $0x18] sm:$0xff]  ;;  %s1050_s29 = scalar_lea.hbm %s1322_s5, 128  ;;  %p1051_p11 = scmp.lt.s32.totalorder %s1045_s13, %s1322_s5 }
  0x36   : > { %373 = vmatpush.bf16.msra.mxu0 %v791_v1  ;;  %850 = vmatpush.bf16.msra.mxu2 %v791_v1  ;;  %v300_v13 = vpack.c.bf16 %v289_v11, %v288_v10  ;;  %v290_v16 = vld [vmem:[%s1240_s15 + $0x50] sm:$0xff]  ;;  %v291_v17 = vld [vmem:[%s1240_s15 + $0x58] sm:$0xff]  ;;  %v297_v18 = vpack.c.bf16 %v283_v15, %v282_v14  ;;  %v798_v22 = vld [vmem:[#allocation7 + $0x28] sm:$0xff] }
  0x37   : > { %v301_v19 = vpack.c.bf16 %v291_v17, %v290_v16  ;;  %v800_v20 = vld [vmem:[#allocation7 + $0x38] sm:$0xff]  ;;  %v799_v21 = vld [vmem:[#allocation7 + $0x30] sm:$0xff]  ;;  %v284_v23 = vld [vmem:[%s1240_s15 + $0x20] sm:$0xff] }
  0x38   : > { %513 = vmatpush.bf16.msra.mxu1 %v800_v20  ;;  %857 = vmatpush.bf16.msra.mxu3 %v800_v20  ;;  %v285_v24 = vld [vmem:[%s1240_s15 + $0x28] sm:$0xff]  ;;  %v292_v25 = vld [vmem:[%s1240_s15 + $0x60] sm:$0xff]  ;;  %v286_v30 = vld [vmem:[%s1240_s15 + $0x30] sm:$0xff] }
  0x39   : > { %v293_v26 = vld [vmem:[%s1240_s15 + $0x68] sm:$0xff]  ;;  %v797_v27 = vld [vmem:[#allocation7 + $0x20] sm:$0xff]  ;;  %v298_v28 = vpack.c.bf16 %v285_v24, %v284_v23  ;;  %v287_v31 = vld [vmem:[%s1240_s15 + $0x38] sm:$0xff] }
  0x3a   : > { %374 = vmatpush.bf16.msra.mxu0 %v790_v2  ;;  %851 = vmatpush.bf16.msra.mxu2 %v790_v2  ;;  %v302_v29 = vpack.c.bf16 %v293_v26, %v292_v25  ;;  %v294_v32 = vld [vmem:[%s1240_s15 + $0x70] sm:$0xff]  ;;  %v295_v33 = vld [vmem:[%s1240_s15 + $0x78] sm:$0xff]  ;;  %v299_v34 = vpack.c.bf16 %v287_v31, %v286_v30  ;;  %v794_v38 = vld [vmem:[#allocation7 + $0x8] sm:$0xff]  ;;  %s1046_s15 = scalar_lea.hbm %s1045_s13, 64 }
  0x3b   : > { %v303_v35 = vpack.c.bf16 %v295_v33, %v294_v32  ;;  %v796_v36 = vld [vmem:[#allocation7 + $0x18] sm:$0xff]  ;;  %v795_v37 = vld [vmem:[#allocation7 + $0x10] sm:$0xff]  ;;  %v793_v39 = vld [vmem:[#allocation7] sm:$0xff]  ;;  %p1047_p1 = scmp.ne.s32.totalorder %s1045_s13, %s1046_s15  ;;  %p1052_p2 = scmp.lt.s32.totalorder %s1050_s29, %s1046_s15 }
  0x3c   : > { %514 = vmatpush.bf16.msra.mxu1 %v799_v21  ;;  %858 = vmatpush.bf16.msra.mxu3 %v799_v21  ;;  %v938_v41 = vld [vmem:[%s1319_s2] ss:$0 sm:$0xff] }
  0x3d   : > { %p1048_p4 = pnand %p1047_p1, %p1206_p3  ;;  %p1053_p9 = por %p1052_p2, %p1051_p11 }
  0x3e   : > { %375 = vmatpush.bf16.msra.mxu0 %v789_v3  ;;  %852 = vmatpush.bf16.msra.mxu2 %v789_v3 }
  0x3f   : > { %p1049_p8 = pneg %p1048_p4 }
  0x40   : > { %515 = vmatpush.bf16.msra.mxu1 %v798_v22  ;;  %859 = vmatpush.bf16.msra.mxu3 %v798_v22 }
  0x41   : > { %p1054_p10 = pnand %p1053_p9, %p1049_p8 }
  0x42   : > { %376 = vmatpush.bf16.msra.mxu0 %v788_v4  ;;  %853 = vmatpush.bf16.msra.mxu2 %v788_v4 }
  0x44   : > { %516 = vmatpush.bf16.msra.mxu1 %v797_v27  ;;  %860 = vmatpush.bf16.msra.mxu3 %v797_v27 }
  0x46   : > { %377 = vmatpush.bf16.msra.mxu0 %v787_v5  ;;  %854 = vmatpush.bf16.msra.mxu2 %v787_v5 }
  0x48   : > { %517 = vmatpush.bf16.msra.mxu1 %v796_v36  ;;  %861 = vmatpush.bf16.msra.mxu3 %v796_v36 }
  0x4a   : > { %378 = vmatpush.bf16.msra.mxu0 %v786_v6  ;;  %855 = vmatpush.bf16.msra.mxu2 %v786_v6 }
  0x4c   : > { %518 = vmatpush.bf16.msra.mxu1 %v795_v37  ;;  %862 = vmatpush.bf16.msra.mxu3 %v795_v37 }
  0x4e   : > { %379 = vmatpush.bf16.msra.mxu0 %v785_v7  ;;  %856 = vmatpush.bf16.msra.mxu2 %v785_v7 }
  0x50   : > { %519 = vmatpush.bf16.msra.mxu1 %v794_v38  ;;  %863 = vmatpush.bf16.msra.mxu3 %v794_v38 }
  0x51   : > { %380 = vmatmul.bf16.vlgmr.msra.gmra.mxu0 %v296_v12  ;;  %400 = vmatmul.bf16.vlgmr.msra.gmra.mxu2 %v300_v13 }
  0x54   : > { %520 = vmatpush.bf16.msra.mxu1 %v793_v39  ;;  %864 = vmatpush.bf16.msra.mxu3 %v793_v39 }
  0x61   : > { %385 = vmatmul.bf16.gmra.mxu0 %v297_v18  ;;  %405 = vmatmul.bf16.gmra.mxu2 %v301_v19 }
  0x71   : > { %390 = vmatmul.bf16.gmra.mxu0 %v298_v28  ;;  %410 = vmatmul.bf16.gmra.mxu2 %v302_v29 }
  0x81   : > { %395 = vmatmul.bf16.gmra.mxu0 %v299_v34  ;;  %415 = vmatmul.bf16.gmra.mxu2 %v303_v35  ;;  %v939_v34 = vld [vmem:[%s1321_s4] ss:$0 sm:$0xff] }
  0xce   : > { %v381_v40 = vpop.f32.mrf.mxu0 }
  0xcf   : > { %v382_v42 = vadd.f32 %v938_v41, %v381_v40 }
  0xd1   : > { %v421_v45 = vmax.f32 %v382_v42, 0.0 }
  0xd4   : > { %v401_v43 = vpop.f32.mrf.mxu2 }
  0xd5   : > { %v402_v48 = vadd.f32 %v938_v41, %v401_v43 }
  0xd6   : > { %v383_v44 = vpop.f32.mrf.mxu0 }
  0xd7   : > { %v384_v46 = vadd.f32 %v938_v41, %v383_v44  ;;  %v429_v53 = vmax.f32 %v402_v48, 0.0 }
  0xd9   : > { %v422_v47 = vmax.f32 %v384_v46, 0.0 }
  0xdb   : > { %v437_v49 = vpack.c.bf16 %v422_v47, %v421_v45 }
  0xdc   : > { %v403_v50 = vpop.f32.mrf.mxu2 }
  0xdd   : > { %v404_v51 = vadd.f32 %v938_v41, %v403_v50  ;;  %521 = vmatmul.bf16.vlgmr.msra.gmra.mxu1 %v437_v49 }
  0xde   : > { %v386_v52 = vpop.f32.mrf.mxu0 }
  0xdf   : > { %v430_v54 = vmax.f32 %v404_v51, 0.0  ;;  %v387_v56 = vadd.f32 %v938_v41, %v386_v52 }
  0xe1   : > { %v441_v55 = vpack.c.bf16 %v430_v54, %v429_v53  ;;  %v423_v59 = vmax.f32 %v387_v56, 0.0 }
  0xe3   : > { %541 = vmatmul.bf16.vlgmr.msra.gmra.mxu3 %v441_v55 }
  0xe4   : > { %v406_v57 = vpop.f32.mrf.mxu2 }
  0xe5   : > { %v407_v62 = vadd.f32 %v938_v41, %v406_v57 }
  0xe6   : > { %v388_v58 = vpop.f32.mrf.mxu0 }
  0xe7   : > { %v389_v60 = vadd.f32 %v938_v41, %v388_v58  ;;  %v431_v3 = vmax.f32 %v407_v62, 0.0 }
  0xe9   : > { %v424_v61 = vmax.f32 %v389_v60, 0.0 }
  0xeb   : > { %v438_v63 = vpack.c.bf16 %v424_v61, %v423_v59 }
  0xec   : > { %v408_v0 = vpop.f32.mrf.mxu2 }
  0xed   : > { %v409_v1 = vadd.f32 %v938_v41, %v408_v0  ;;  %526 = vmatmul.bf16.gmra.mxu1 %v438_v63 }
  0xee   : > { %v391_v2 = vpop.f32.mrf.mxu0 }
  0xef   : > { %v432_v4 = vmax.f32 %v409_v1, 0.0  ;;  %v392_v6 = vadd.f32 %v938_v41, %v391_v2 }
  0xf1   : > { %v442_v5 = vpack.c.bf16 %v432_v4, %v431_v3  ;;  %v425_v9 = vmax.f32 %v392_v6, 0.0 }
  0xf3   : > { %546 = vmatmul.bf16.gmra.mxu3 %v442_v5 }
  0xf4   : > { %v411_v7 = vpop.f32.mrf.mxu2 }
  0xf5   : > { %v412_v12 = vadd.f32 %v938_v41, %v411_v7 }
  0xf6   : > { %v393_v8 = vpop.f32.mrf.mxu0 }
  0xf7   : > { %v394_v10 = vadd.f32 %v938_v41, %v393_v8  ;;  %v433_v17 = vmax.f32 %v412_v12, 0.0 }
  0xf9   : > { %v426_v11 = vmax.f32 %v394_v10, 0.0 }
  0xfb   : > { %v439_v13 = vpack.c.bf16 %v426_v11, %v425_v9 }
  0xfc   : > { %v413_v14 = vpop.f32.mrf.mxu2 }
  0xfd   : > { %v414_v15 = vadd.f32 %v938_v41, %v413_v14  ;;  %531 = vmatmul.bf16.gmra.mxu1 %v439_v13 }
  0xfe   : > { %v396_v16 = vpop.f32.mrf.mxu0 }
  0xff   : > { %v434_v18 = vmax.f32 %v414_v15, 0.0  ;;  %v397_v20 = vadd.f32 %v938_v41, %v396_v16 }
 0x101   : > { %v443_v19 = vpack.c.bf16 %v434_v18, %v433_v17  ;;  %v427_v23 = vmax.f32 %v397_v20, 0.0 }
 0x103   : > { %551 = vmatmul.bf16.gmra.mxu3 %v443_v19 }
 0x104   : > { %v416_v21 = vpop.f32.mrf.mxu2 }
 0x105   : > { %v417_v26 = vadd.f32 %v938_v41, %v416_v21 }
 0x106   : > { %v398_v22 = vpop.f32.mrf.mxu0 }
 0x107   : > { %v399_v24 = vadd.f32 %v938_v41, %v398_v22  ;;  %v435_v30 = vmax.f32 %v417_v26, 0.0 }
 0x109   : > { %v428_v25 = vmax.f32 %v399_v24, 0.0 }
 0x10b   : > { %v440_v27 = vpack.c.bf16 %v428_v25, %v427_v23 }
 0x10c   : > { %v418_v28 = vpop.f32.mrf.mxu2 }
 0x10d   : > { %v419_v29 = vadd.f32 %v938_v41, %v418_v28  ;;  %536 = vmatmul.bf16.gmra.mxu1 %v440_v27 }
 0x10f   : > { %v436_v31 = vmax.f32 %v419_v29, 0.0 }
 0x111   : > { %v444_v32 = vpack.c.bf16 %v436_v31, %v435_v30 }
 0x113   : > { %556 = vmatmul.bf16.gmra.mxu3 %v444_v32 }
 0x15a   : > { %v522_v33 = vpop.f32.mrf.mxu1 }
 0x15b   : > { %v523_v36 = vadd.f32 %v939_v34, %v522_v33 }
 0x162   : > { %v524_v35 = vpop.f32.mrf.mxu1 }
 0x163   : > { %v525_v37 = vadd.f32 %v939_v34, %v524_v35 }
 0x165   : > { %v805_v38 = vpack.c.bf16 %v525_v37, %v523_v36 }
 0x166   : > { %v542_v39 = vpop.f32.mrf.mxu3 }
 0x167   : > { %806 = vst [vmem:[%s1273_s12] sm:$0xff] %v805_v38   ;;  %v543_v42 = vadd.f32 %v939_v34, %v542_v39 }
 0x16a   : > { %v527_v40 = vpop.f32.mrf.mxu1 }
 0x16b   : > { %v528_v46 = vadd.f32 %v939_v34, %v527_v40 }
 0x16e   : > { %v544_v41 = vpop.f32.mrf.mxu3 }
 0x16f   : > { %v545_v43 = vadd.f32 %v939_v34, %v544_v41 }
 0x171   : > { %v825_v44 = vpack.c.bf16 %v545_v43, %v543_v42 }
 0x172   : > { %v529_v45 = vpop.f32.mrf.mxu1 }
 0x173   : > { %845 = vst [vmem:[%s1273_s12 + $0x20] sm:$0xff] %v825_v44   ;;  %v530_v47 = vadd.f32 %v939_v34, %v529_v45 }
 0x175   : > { %v810_v48 = vpack.c.bf16 %v530_v47, %v528_v46 }
 0x176   : > { %v547_v49 = vpop.f32.mrf.mxu3 }
 0x177   : > { %842 = vst [vmem:[%s1273_s12 + $0x8] sm:$0xff] %v810_v48   ;;  %v548_v52 = vadd.f32 %v939_v34, %v547_v49 }
 0x17a   : > { %v532_v50 = vpop.f32.mrf.mxu1 }
 0x17b   : > { %v533_v56 = vadd.f32 %v939_v34, %v532_v50 }
 0x17e   : > { %v549_v51 = vpop.f32.mrf.mxu3 }
 0x17f   : > { %v550_v53 = vadd.f32 %v939_v34, %v549_v51 }
 0x181   : > { %v830_v54 = vpack.c.bf16 %v550_v53, %v548_v52 }
 0x182   : > { %v534_v55 = vpop.f32.mrf.mxu1 }
 0x183   : > { %846 = vst [vmem:[%s1273_s12 + $0x28] sm:$0xff] %v830_v54   ;;  %v535_v57 = vadd.f32 %v939_v34, %v534_v55 }
 0x185   : > { %v815_v58 = vpack.c.bf16 %v535_v57, %v533_v56 }
 0x186   : > { %v552_v59 = vpop.f32.mrf.mxu3 }
 0x187   : > { %843 = vst [vmem:[%s1273_s12 + $0x10] sm:$0xff] %v815_v58   ;;  %v553_v62 = vadd.f32 %v939_v34, %v552_v59 }
 0x18a   : > { %v537_v60 = vpop.f32.mrf.mxu1 }
 0x18b   : > { %v538_v2 = vadd.f32 %v939_v34, %v537_v60 }
 0x18e   : > { %v554_v61 = vpop.f32.mrf.mxu3 }
 0x18f   : > { %v555_v63 = vadd.f32 %v939_v34, %v554_v61 }
 0x191   : > { %v835_v0 = vpack.c.bf16 %v555_v63, %v553_v62 }
 0x192   : > { %v539_v1 = vpop.f32.mrf.mxu1 }
 0x193   : > { %847 = vst [vmem:[%s1273_s12 + $0x30] sm:$0xff] %v835_v0   ;;  %v540_v3 = vadd.f32 %v939_v34, %v539_v1 }
 0x195   : > { %v820_v4 = vpack.c.bf16 %v540_v3, %v538_v2 }
 0x196   : > { %v557_v5 = vpop.f32.mrf.mxu3 }
 0x197   : > { %844 = vst [vmem:[%s1273_s12 + $0x18] sm:$0xff] %v820_v4   ;;  %v558_v7 = vadd.f32 %v939_v34, %v557_v5 }
 0x19e   : > { %v559_v6 = vpop.f32.mrf.mxu3 }
 0x19f   : > { %v560_v8 = vadd.f32 %v939_v34, %v559_v6 }
 0x1a1   : > { %v840_v9 = vpack.c.bf16 %v560_v8, %v558_v7 }
 0x1a3   : > { %848 = vst [vmem:[%s1273_s12 + $0x38] sm:$0xff] %v840_v9  }
 0x1a4   : > { %1057 = shalt.err (!%p1054_p10)
}
 0x1a5   : > { %s1108_s8 = smov 64   ;;  %s1109_s11 = smov 4  }
 0x1a6   : > { %875 = dma.vmem_to_hbm [thread:$0]  (%p1206_p3), %s608_s26, 1024, %s610_s7, %s595_s16, %s1108_s8, %s1108_s8, %s1109_s11  }
 0x1a7 PF: > { %s624_s12 = sand.u32 1, %s1088_s18   ;;  %p1328_p12 = scmp.ge.s32.totalorder %s1100_s21, 2 }
 0x1a8   : > { %s625_s27 = scalar_lea.sflag [#allocation4], %s624_s12 }
 0x1a9   : > { %p889_p13 = pnand %p1328_p12, %p1175_p6 }
 0x1ab   : > { %p890_p0 = pneg %p889_p13 }
 0x1ad   : > { %1083 = dma.done.wait (%p890_p0), %s625_s27, 1024  }
 0x1ae   : > { %1085 = vsyncadd (%p890_p0), %s625_s27, 4294966272  ;;  %p19_p5 = scmp.ge.s32.totalorder %s1196_s14, 4   ;;  %s1329_s18 = smov %s1092_s19 }
 0x1af   : > { %s1330_s19 = smov %s1096_s20  ;;  %s1331_s20 = smov %s1212_s23 }
 0x1b0   : > { %s1332_s21 = smov %s1196_s14  ;;  %21 = sbr.rel (!%p19_p5) target bundleno = 6 (0x6), region = 93 }
 0x1b5   :  { %631 = vsyncpa [#allocation3], 1 }
 0x1b6   :  { %633 = vsyncpa [#allocation3 + $0x1], 1 }
 0x1b7   :  { %634 = vsyncpa [#allocation6], 1 }
 0x1b8   :  { %635 = vsyncpa [#allocation4], 1 }
 0x1b9   :  { %637 = vsyncpa [#allocation4 + $0x1], 1 }

</bundles_post_ra>
